<compile_context>
chip_gen: v6e
topology: v6e:2x2x1
jax: 0.10.0
libtpu: 0.0.40
codegen_flags: <defaults>
</compile_context>

<pallas_src>
import jax
import jax.numpy as jnp
import numpy as np
from jax.experimental import pallas as pl
from jax.experimental.pallas import tpu as pltpu

BN_EPS = 1e-5
LANE = 128


def _round_up(n, m):
    return ((n + m - 1) // m) * m


def _act(x, lrelu):
    # nn.LeakyReLU default negative_slope = 0.01 ; nn.ReLU otherwise.
    return jnp.where(x > 0, x, 0.01 * x) if lrelu else jnp.maximum(x, 0.0)


def _bn_train(h, gamma, beta):
    # BatchNorm1d, training mode: batch statistics (biased variance).
    # Single centering pass; centered value reused for the normalize step.
    mean = jnp.mean(h, axis=0, keepdims=True)
    hc = h - mean
    var = jnp.mean(hc * hc, axis=0, keepdims=True)
    return hc * jax.lax.rsqrt(var + BN_EPS) * gamma + beta


def _make_kernel(has_x, batchnorm, lrelu):
    """Build the fused kernel for one (has_x, batchnorm, activation) variant."""

    def kernel(*refs):
        idx = 0
        if has_x:
            x_ref = refs[idx]
            idx += 1
        z_ref, wfc_ref, bfc_ref, wm_ref, bm_ref = refs[idx:idx + 5]
        idx += 5
        if batchnorm:
            gamma_ref, beta_ref = refs[idx:idx + 2]
            idx += 2
        o_ref = refs[idx]

        # a = act(fc(z)); padded columns of wfc/bfc are zero -> a_pad = act(0) = 0.
        a = _act(
            jnp.dot(z_ref[...], wfc_ref[...], preferred_element_type=jnp.float32)
            + bfc_ref[...],
            lrelu,
        )
        # concat([a, x_pad]) along lanes (both widths are multiples of 128) and a
        # single MXU push against the repacked main weight slab for this N tile.
        h_in = jnp.concatenate([a, x_ref[...]], axis=1) if has_x else a
        h = (
            jnp.dot(h_in, wm_ref[...], preferred_element_type=jnp.float32)
            + bm_ref[...]
        )
        if batchnorm:
            h = _bn_train(h, gamma_ref[...], beta_ref[...])
        o_ref[...] = _act(h, lrelu).astype(o_ref.dtype)

    return kernel


def _linear_init(key, fan_in, fan_out):
    # PyTorch nn.Linear default: U(-1/sqrt(fan_in), 1/sqrt(fan_in)) for W and b.
    kw, kb = jax.random.split(key)
    bound = 1.0 / np.sqrt(fan_in)
    w = jax.random.uniform(kw, (fan_in, fan_out), jnp.float32, -bound, bound)
    b = jax.random.uniform(kb, (1, fan_out), jnp.float32, -bound, bound)
    return w, b


def make_decode_layer(input_dim, output_dim, zdim, batchnorm, activation, key):
    """Returns (logical params dict, apply_fn(x_or_None, z))."""
    lrelu = (activation == "lrelu")
    k1, k2 = jax.random.split(key)

    if input_dim == 0:
        fc_out = output_dim          # input = output
        main_in = output_dim
    else:
        fc_out = input_dim
        main_in = 2 * input_dim      # input *= 2

    # ---- logical (PyTorch-layout, transposed) parameters -------------------
    wfc, bfc = _linear_init(k1, zdim, fc_out)          # fc  : zdim   -> fc_out
    wm, bm = _linear_init(k2, main_in, output_dim)     # main: main_in -> output
    gamma = jnp.ones((1, output_dim), jnp.float32)     # BatchNorm affine init
    beta = jnp.zeros((1, output_dim), jnp.float32)
    params = dict(wfc=wfc, bfc=bfc, wm=wm, bm=bm, gamma=gamma, beta=beta)

    # ---- lane-dense, repacked device copies (built ONCE, not per call) -----
    Fp = _round_up(fc_out, LANE)                 # padded width of a = act(fc(z))
    Np = _round_up(output_dim, LANE)             # padded output width
    Cx = _round_up(input_dim, LANE) if input_dim > 0 else 0
    Kp = Fp + Cx                                 # contraction dim of the main dot

    wfc_p = jnp.zeros((zdim, Fp), jnp.float32).at[:, :fc_out].set(wfc)
    bfc_p = jnp.zeros((1, Fp), jnp.float32).at[:, :fc_out].set(bfc)

    # Main weight repacked for the [a | x] concat order; pad rows/cols are zero.
    wm_p = jnp.zeros((Kp, Np), jnp.float32)
    if input_dim == 0:
        wm_p = wm_p.at[:fc_out, :output_dim].set(wm)
    else:
        wm_p = wm_p.at[:fc_out, :output_dim].set(wm[input_dim:])           # a part
        wm_p = wm_p.at[Fp:Fp + input_dim, :output_dim].set(wm[:input_dim])  # x part
    bm_p = jnp.zeros((1, Np), jnp.float32).at[:, :output_dim].set(bm)
    gamma_p = jnp.ones((1, Np), jnp.float32).at[:, :output_dim].set(gamma)
    beta_p = jnp.zeros((1, Np), jnp.float32).at[:, :output_dim].set(beta)

    # N-tile: 256 is a safe default for v7x's 64 MiB VMEM; 128 when Np is small.
    TN = 256 if Np % 256 == 0 else 128
    grid = (Np // TN,)

    const = lambda j: (0, 0)       # whole-array operands: DMA'd once
    coltile = lambda j: (0, j)     # per-output-feature-tile operands

    def apply_fn(x, z):
        assert (x is None) == (input_dim == 0), "x must be None iff input_dim == 0"
        B = z.shape[0]

        args = []
        in_specs = []
        if x is not None:
            # Pad x to a 128 multiple once (lane-aligned in-kernel concat);
            # the matching weight rows are zero so the pad contributes nothing.
            x_pad = jnp.pad(x, ((0, 0), (0, Cx - input_dim)))
            args.append(x_pad)
            in_specs.append(pl.BlockSpec((B, Cx), const))

        args += [z, wfc_p, bfc_p, wm_p, bm_p]
        in_specs += [
            pl.BlockSpec((B, zdim), const),
            pl.BlockSpec((zdim, Fp), const),
            pl.BlockSpec((1, Fp), const),
            pl.BlockSpec((Kp, TN), coltile),
            pl.BlockSpec((1, TN), coltile),
        ]
        if batchnorm:
            args += [gamma_p, beta_p]
            in_specs += [pl.BlockSpec((1, TN), coltile),
                         pl.BlockSpec((1, TN), coltile)]

        flops = 2 * B * zdim * Fp + 2 * B * Kp * Np + 8 * B * Np
        bytes_accessed = 4 * (
            B * zdim
            + (B * Cx if x is not None else 0)
            + zdim * Fp + Fp
            + Kp * Np + Np * (1 + (2 if batchnorm else 0))
            + B * Np
        )

        kern = _make_kernel(has_x=x is not None, batchnorm=batchnorm, lrelu=lrelu)
        out_padded = pl.pallas_call(
            kern,
            grid=grid,
            in_specs=in_specs,
            out_specs=pl.BlockSpec((B, TN), coltile),
            out_shape=jax.ShapeDtypeStruct((B, Np), jnp.float32),
            compiler_params=pltpu.CompilerParams(
                dimension_semantics=("parallel",),       # shards N tiles on v7x's 2 TCs
                vmem_limit_bytes=32 * 1024 * 1024,
            ),
            cost_estimate=pl.CostEstimate(
                flops=flops, transcendentals=0, bytes_accessed=bytes_accessed),
        )(*args)
        return out_padded[:, :output_dim]

    return params, apply_fn


def _ref_forward(x, z, params, input_dim, batchnorm, activation):
    """Pure-JAX reference mirroring the PyTorch forward (for verification)."""
    act = (lambda v: jnp.where(v > 0, v, 0.01 * v)) if activation == "lrelu" \
        else (lambda v: jnp.maximum(v, 0.0))
    a = act(z @ params["wfc"] + params["bfc"])
    h = a if x is None else jnp.concatenate([x, a], axis=1)
    y = h @ params["wm"] + params["bm"]
    if batchnorm:
        mean = jnp.mean(y, axis=0, keepdims=True)
        var = jnp.mean((y - mean) ** 2, axis=0, keepdims=True)
        y = (y - mean) * jax.lax.rsqrt(var + BN_EPS) * params["gamma"] + params["beta"]
    return act(y)


if __name__ == "__main__":
    key = jax.random.PRNGKey(0)
    kx, kz, kp1, kp2 = jax.random.split(key, 4)

    B, C_IN, C_OUT, ZDIM = 8, 32, 64, 16

    x = jax.random.normal(kx, (B, C_IN), jnp.float32)
    z = jax.random.normal(kz, (B, ZDIM), jnp.float32)

    # Case 1: skip-input present, batchnorm=True, lrelu (the common decode layer).
    params1, layer1 = make_decode_layer(C_IN, C_OUT, ZDIM, batchnorm=True,
                                        activation="lrelu", key=kp1)
    out1 = jax.block_until_ready(layer1(x, z))
    ref1 = _ref_forward(x, z, params1, C_IN, True, "lrelu")
    assert out1.shape == (B, C_OUT)
    np.testing.assert_allclose(np.asarray(out1), np.asarray(ref1), atol=1e-4, rtol=1e-4)

    # Case 2: first decode layer (input == 0 in __init__, forward gets input=None).
    params2, layer2 = make_decode_layer(0, C_OUT, ZDIM, batchnorm=False,
                                        activation="relu", key=kp2)
    out2 = jax.block_until_ready(layer2(None, z))
    ref2 = _ref_forward(None, z, params2, 0, False, "relu")
    assert out2.shape == (B, C_OUT)
    np.testing.assert_allclose(np.asarray(out2), np.asarray(ref2), atol=1e-4, rtol=1e-4)

    print("KERNEL_OK")
</pallas_src>

<mosaic_0001>
module attributes {stable_mosaic.version = 11 : i64} {
  func.func @kernel(%arg0: i32, %arg1: memref<8x128xf32, #tpu.memory_space<vmem>>, %arg2: memref<8x16xf32, #tpu.memory_space<vmem>>, %arg3: memref<16x128xf32, #tpu.memory_space<vmem>>, %arg4: memref<1x128xf32, #tpu.memory_space<vmem>>, %arg5: memref<256x128xf32, #tpu.memory_space<vmem>>, %arg6: memref<1x128xf32, #tpu.memory_space<vmem>>, %arg7: memref<1x128xf32, #tpu.memory_space<vmem>>, %arg8: memref<1x128xf32, #tpu.memory_space<vmem>>, %arg9: memref<8x128xf32, #tpu.memory_space<vmem>>) attributes {dimension_semantics = [#tpu.dimension_semantics<parallel>], iteration_bounds = array<i64: 1>, scalar_prefetch = 0 : i64, scratch_operands = 0 : i64, tpu.core_type = #tpu.core_type<tc>, window_params = [{pipeline_mode = #tpu.pipeline_mode<synchronous>, transform_indices = @transform_0, window_bounds = array<i64: 8, 128>}, {pipeline_mode = #tpu.pipeline_mode<synchronous>, transform_indices = @transform_1, window_bounds = array<i64: 8, 16>}, {pipeline_mode = #tpu.pipeline_mode<synchronous>, transform_indices = @transform_2, window_bounds = array<i64: 16, 128>}, {pipeline_mode = #tpu.pipeline_mode<synchronous>, transform_indices = @transform_3, window_bounds = array<i64: 1, 128>}, {transform_indices = @transform_4, window_bounds = array<i64: 256, 128>}, {transform_indices = @transform_5, window_bounds = array<i64: 1, 128>}, {transform_indices = @transform_6, window_bounds = array<i64: 1, 128>}, {transform_indices = @transform_7, window_bounds = array<i64: 1, 128>}, {transform_indices = @transform_8, window_bounds = array<i64: 8, 128>}]} {
    %c0 = arith.constant 0 : index
    %c0_0 = arith.constant 0 : index
    %0 = vector.load %arg2[%c0, %c0_0] : memref<8x16xf32, #tpu.memory_space<vmem>>, vector<8x16xf32>
    %c0_1 = arith.constant 0 : index
    %c0_2 = arith.constant 0 : index
    %1 = vector.load %arg3[%c0_1, %c0_2] : memref<16x128xf32, #tpu.memory_space<vmem>>, vector<16x128xf32>
    %cst = arith.constant dense<0.000000e+00> : vector<8x128xf32>
    %2 = tpu.matmul %0, %1, %cst {dimension_numbers = #tpu.dot_dimension_numbers<[1], [0], [0], [1], [0, 0, 1, 1], [], []>} : vector<8x16xf32>, vector<16x128xf32>, vector<8x128xf32> -> vector<8x128xf32>
    %c0_3 = arith.constant 0 : index
    %c0_4 = arith.constant 0 : index
    %3 = vector.load %arg4[%c0_3, %c0_4] : memref<1x128xf32, #tpu.memory_space<vmem>>, vector<1x128xf32>
    %4 = vector.broadcast %3 : vector<1x128xf32> to vector<8x128xf32>
    %5 = arith.addf %2, %4 : vector<8x128xf32>
    %cst_5 = arith.constant 0.000000e+00 : f32
    %6 = vector.broadcast %cst_5 : f32 to vector<8x128xf32>
    %7 = arith.cmpf ogt, %5, %6 : vector<8x128xf32>
    %cst_6 = arith.constant 0.00999999977 : f32
    %8 = vector.broadcast %cst_6 : f32 to vector<8x128xf32>
    %9 = arith.mulf %8, %5 : vector<8x128xf32>
    %10 = arith.select %7, %5, %9 : vector<8x128xi1>, vector<8x128xf32>
    %c0_7 = arith.constant 0 : index
    %c0_8 = arith.constant 0 : index
    %11 = vector.load %arg1[%c0_7, %c0_8] : memref<8x128xf32, #tpu.memory_space<vmem>>, vector<8x128xf32>
    %12 = tpu.concatenate %10, %11 in 1 : vector<8x128xf32>, vector<8x128xf32> -> vector<8x256xf32>
    %c0_9 = arith.constant 0 : index
    %c0_10 = arith.constant 0 : index
    %13 = vector.load %arg5[%c0_9, %c0_10] : memref<256x128xf32, #tpu.memory_space<vmem>>, vector<256x128xf32>
    %cst_11 = arith.constant dense<0.000000e+00> : vector<8x128xf32>
    %14 = tpu.matmul %12, %13, %cst_11 {dimension_numbers = #tpu.dot_dimension_numbers<[1], [0], [0], [1], [0, 0, 1, 1], [], []>} : vector<8x256xf32>, vector<256x128xf32>, vector<8x128xf32> -> vector<8x128xf32>
    %c0_12 = arith.constant 0 : index
    %c0_13 = arith.constant 0 : index
    %15 = vector.load %arg6[%c0_12, %c0_13] : memref<1x128xf32, #tpu.memory_space<vmem>>, vector<1x128xf32>
    %16 = vector.broadcast %15 : vector<1x128xf32> to vector<8x128xf32>
    %17 = arith.addf %14, %16 : vector<8x128xf32>
    %c0_14 = arith.constant 0 : index
    %c0_15 = arith.constant 0 : index
    %18 = vector.load %arg7[%c0_14, %c0_15] : memref<1x128xf32, #tpu.memory_space<vmem>>, vector<1x128xf32>
    %c0_16 = arith.constant 0 : index
    %c0_17 = arith.constant 0 : index
    %19 = vector.load %arg8[%c0_16, %c0_17] : memref<1x128xf32, #tpu.memory_space<vmem>>, vector<1x128xf32>
    %cst_18 = arith.constant dense<0.000000e+00> : vector<128xf32>
    %20 = vector.multi_reduction <add>, %17, %cst_18 [0] : vector<8x128xf32> to vector<128xf32>
    %21 = vector.shape_cast %20 : vector<128xf32> to vector<1x128xf32>
    %cst_19 = arith.constant 8.000000e+00 : f32
    %22 = vector.broadcast %cst_19 : f32 to vector<1x128xf32>
    %23 = arith.divf %21, %22 : vector<1x128xf32>
    %24 = vector.broadcast %23 : vector<1x128xf32> to vector<8x128xf32>
    %25 = arith.subf %17, %24 : vector<8x128xf32>
    %26 = arith.mulf %25, %25 : vector<8x128xf32>
    %cst_20 = arith.constant dense<0.000000e+00> : vector<128xf32>
    %27 = vector.multi_reduction <add>, %26, %cst_20 [0] : vector<8x128xf32> to vector<128xf32>
    %28 = vector.shape_cast %27 : vector<128xf32> to vector<1x128xf32>
    %cst_21 = arith.constant 8.000000e+00 : f32
    %29 = vector.broadcast %cst_21 : f32 to vector<1x128xf32>
    %30 = arith.divf %28, %29 : vector<1x128xf32>
    %cst_22 = arith.constant 9.99999974E-6 : f32
    %31 = vector.broadcast %cst_22 : f32 to vector<1x128xf32>
    %32 = arith.addf %30, %31 : vector<1x128xf32>
    %33 = math.rsqrt %32 : vector<1x128xf32>
    %34 = vector.broadcast %33 : vector<1x128xf32> to vector<8x128xf32>
    %35 = arith.mulf %25, %34 : vector<8x128xf32>
    %36 = vector.broadcast %18 : vector<1x128xf32> to vector<8x128xf32>
    %37 = arith.mulf %35, %36 : vector<8x128xf32>
    %38 = vector.broadcast %19 : vector<1x128xf32> to vector<8x128xf32>
    %39 = arith.addf %37, %38 : vector<8x128xf32>
    %cst_23 = arith.constant 0.000000e+00 : f32
    %40 = vector.broadcast %cst_23 : f32 to vector<8x128xf32>
    %41 = arith.cmpf ogt, %39, %40 : vector<8x128xf32>
    %cst_24 = arith.constant 0.00999999977 : f32
    %42 = vector.broadcast %cst_24 : f32 to vector<8x128xf32>
    %43 = arith.mulf %42, %39 : vector<8x128xf32>
    %44 = arith.select %41, %39, %43 : vector<8x128xi1>, vector<8x128xf32>
    %c0_25 = arith.constant 0 : index
    %c0_26 = arith.constant 0 : index
    %45 = vector.load %arg9[%c0_25, %c0_26] : memref<8x128xf32, #tpu.memory_space<vmem>>, vector<8x128xf32>
    tpu.vector_store %arg9[%c0_25, %c0_26], %44 {strides = array<i32>} : memref<8x128xf32, #tpu.memory_space<vmem>>, vector<8x128xf32>,
    return
  }
  func.func @transform_0(%arg0: i32) -> (i32, i32) {
    %c0_i32 = arith.constant 0 : i32
    %c0_i32_0 = arith.constant 0 : i32
    %c0_i32_1 = arith.constant 0 : i32
    return %c0_i32, %c0_i32_0 : i32, i32
  }
  func.func @transform_1(%arg0: i32) -> (i32, i32) {
    %c0_i32 = arith.constant 0 : i32
    %c0_i32_0 = arith.constant 0 : i32
    %c0_i32_1 = arith.constant 0 : i32
    return %c0_i32, %c0_i32_0 : i32, i32
  }
  func.func @transform_2(%arg0: i32) -> (i32, i32) {
    %c0_i32 = arith.constant 0 : i32
    %c0_i32_0 = arith.constant 0 : i32
    %c0_i32_1 = arith.constant 0 : i32
    return %c0_i32, %c0_i32_0 : i32, i32
  }
  func.func @transform_3(%arg0: i32) -> (i32, i32) {
    %c0_i32 = arith.constant 0 : i32
    %c0_i32_0 = arith.constant 0 : i32
    %c0_i32_1 = arith.constant 0 : i32
    return %c0_i32, %c0_i32_0 : i32, i32
  }
  func.func @transform_4(%arg0: i32) -> (i32, i32) {
    %c0_i32 = arith.constant 0 : i32
    %c0_i32_0 = arith.constant 0 : i32
    return %c0_i32, %arg0 : i32, i32
  }
  func.func @transform_5(%arg0: i32) -> (i32, i32) {
    %c0_i32 = arith.constant 0 : i32
    %c0_i32_0 = arith.constant 0 : i32
    return %c0_i32, %arg0 : i32, i32
  }
  func.func @transform_6(%arg0: i32) -> (i32, i32) {
    %c0_i32 = arith.constant 0 : i32
    %c0_i32_0 = arith.constant 0 : i32
    return %c0_i32, %arg0 : i32, i32
  }
  func.func @transform_7(%arg0: i32) -> (i32, i32) {
    %c0_i32 = arith.constant 0 : i32
    %c0_i32_0 = arith.constant 0 : i32
    return %c0_i32, %arg0 : i32, i32
  }
  func.func @transform_8(%arg0: i32) -> (i32, i32) {
    %c0_i32 = arith.constant 0 : i32
    %c0_i32_0 = arith.constant 0 : i32
    return %c0_i32, %arg0 : i32, i32
  }
}

</mosaic_0001>

<bundles_post_ra>
// kernel: tpu_custom_call.1
= control target key start
LH: loop header
LB: loop body
LE: loop exit
PB: predicated region body
PF: predicated region fallthrough
CT: control target
= control target key end

     0   :  { %13 = vsyncpa [#allocation3], 0  ;;  %s585_s0 = inlined_call_operand.hbm [shape: f32[8,128], index: 0, kind: input, shape index: {}]   ;;  %s586_s1 = inlined_call_operand.hbm [shape: f32[8,16], index: 1, kind: input, shape index: {}]   ;;  %s587_s2 = inlined_call_operand.hbm [shape: f32[16,128], index: 2, kind: input, shape index: {}]   ;;  %s588_s3 = inlined_call_operand.vmem [shape: f32[1,128], index: 3, kind: input, shape index: {}]   ;;  %s589_s4 = inlined_call_operand.hbm [shape: f32[256,128], index: 4, kind: input, shape index: {}]   ;;  %s590_s5 = inlined_call_operand.vmem [shape: f32[1,128], index: 5, kind: input, shape index: {}]   ;;  %s591_s6 = inlined_call_operand.vmem [shape: f32[1,128], index: 6, kind: input, shape index: {}]   ;;  %s592_s7 = inlined_call_operand.vmem [shape: f32[1,128], index: 7, kind: input, shape index: {}]   ;;  %s593_s8 = inlined_call_operand.hbm [shape: f32[8,128], index: 8, kind: output, shape index: {}]  }
   0x1   :  { %14 = vsyncpa [#allocation6], 0 }
   0x2   :  { %15 = vsyncpa [#allocation9], 0 }
   0x3   :  { %16 = vsyncpa [#allocation4], 0  ;;  %s504_s27 = smov [#allocation5]   ;;  %s505_s29 = smov [#allocation2]  }
   0x4   :  { %s33_s28 = sshll.u32 %s504_s27, 4  ;;  %s23_s30 = sshll.u32 %s505_s29, 4  ;;  %s34_s28 = int_to_ptr.vmem [resolvable:$true] %s33_s28  ;;  %s24_s30 = int_to_ptr.vmem [resolvable:$true] %s23_s30 }
   0x5   :  { %s404_s9 = scalar_lea.vmem %s34_s28, 128  ;;  %p409_p1 = scmp.lt.s32.totalorder %s34_s28, %s34_s28 }
   0x6   :  { %p405_p0 = scmp.ne.s32.totalorder %s34_s28, %s404_s9  ;;  %p410_p2 = scmp.lt.s32.totalorder %s404_s9, %s404_s9 }
   0x8   :  { %p411_p3 = por %p410_p2, %p409_p1 }
   0xa   :  { %p412_p4 = pnand %p411_p3, %p405_p0 }
   0xc   :  { %415 = shalt.err (!%p412_p4)
}
   0xd   :  { %36 = dma.hbm_to_vmem [thread:$0]  %s586_s1, 128, %s34_s28, [#allocation6]  }
   0xe   :  { %s424_s12 = scalar_lea.vmem %s24_s30, 128  ;;  %p429_p6 = scmp.lt.s32.totalorder %s24_s30, %s24_s30 }
   0xf   :  { %p425_p5 = scmp.ne.s32.totalorder %s24_s30, %s424_s12  ;;  %p430_p7 = scmp.lt.s32.totalorder %s424_s12, %s424_s12 }
  0x11   :  { %p431_p8 = por %p430_p7, %p429_p6 }
  0x13   :  { %p432_p9 = pnand %p431_p8, %p425_p5 }
  0x15   :  { %435 = shalt.err (!%p432_p9)
}
  0x16   :  { %26 = dma.hbm_to_vmem [thread:$0]  %s585_s0, 128, %s24_s30, [#allocation3]  }
  0x17   :  { %s506_s15 = smov [#allocation7]  }
  0x18   :  { %s42_s16 = sshll.u32 %s506_s15, 4  ;;  %s43_s16 = int_to_ptr.vmem [resolvable:$true] %s42_s16 }
  0x19   :  { %s444_s17 = scalar_lea.vmem %s43_s16, 256  ;;  %p449_p11 = scmp.lt.s32.totalorder %s43_s16, %s43_s16 }
  0x1a   :  { %p445_p10 = scmp.ne.s32.totalorder %s43_s16, %s444_s17  ;;  %p450_p12 = scmp.lt.s32.totalorder %s444_s17, %s444_s17 }
  0x1c   :  { %p451_p13 = por %p450_p12, %p449_p11 }
  0x1e   :  { %p452_p0 = pnand %p451_p13, %p445_p10 }
  0x20   :  { %455 = shalt.err (!%p452_p0)
}
  0x21   :  { %s507_s1 = smov 128   ;;  %s508_s18 = smov 8  }
  0x22   :  { %48 = dma.hbm_to_vmem [thread:$0]  %s587_s2, 256, %s43_s16, [#allocation6], %s507_s1, %s507_s1, %s508_s18  }
  0x23   :  { %s509_s21 = smov [#allocation8]  }
  0x24   :  { %s56_s22 = sshll.u32 %s509_s21, 4  ;;  %s57_s22 = int_to_ptr.vmem [resolvable:$true] %s56_s22 }
  0x25   :  { %s464_s0 = scalar_lea.vmem %s57_s22, 4096  ;;  %p469_p2 = scmp.lt.s32.totalorder %s57_s22, %s57_s22 }
  0x26   :  { %p465_p1 = scmp.ne.s32.totalorder %s57_s22, %s464_s0  ;;  %p470_p3 = scmp.lt.s32.totalorder %s464_s0, %s464_s0 }
  0x28   :  { %p471_p4 = por %p470_p3, %p469_p2 }
  0x2a   :  { %p472_p5 = pnand %p471_p4, %p465_p1 }
  0x2c   :  { %475 = shalt.err (!%p472_p5)
}
  0x2d   :  { %62 = dma.hbm_to_vmem [thread:$0]  %s589_s4, 4096, %s57_s22, [#allocation9], %s507_s1, %s507_s1, %s508_s18  }
  0x2e   :  { %496 = dma.done.wait [#allocation3], 128  }
  0x2f   :  { %497 = vsyncadd [#allocation3], 4294967168 }
  0x30   :  { %498 = dma.done.wait [#allocation6], 384  }
  0x31   :  { %499 = vsyncadd [#allocation6], 4294966912 }
  0x32   :  { %500 = dma.done.wait [#allocation9], 4096  }
  0x33   :  { %501 = vsyncadd [#allocation9], 4294963200  ;;  %v510_v0 = vmov 0.0   ;;  %vm511_vm0 = vmmov 0   ;;  %v83_v1 = vld [vmem:[#allocation7 + $0x8] sm:$0xff]  ;;  %v82_v2 = vld [vmem:[#allocation7] sm:$0xff] }
  0x34   :  { %378 = vmatprep.subr.mxu0 %v510_v0  ;;  %382 = vmatprep.mubr.msk.f32.mxu0 %vm511_vm0, %v510_v0  ;;  %v81_v3 = vld [vmem:[#allocation5] sm:$0xff]  ;;  %vm91_vm1 = vcmask 130048   ;;  %v200_v4 = vld [vmem:[#allocation8 + $0xf8] sm:$0xff]  ;;  %v199_v6 = vld [vmem:[#allocation8 + $0xf0] sm:$0xff]  ;;  %s512_s29 = smov [#allocation10]  }
  0x35   :  { %379 = vmatpush3.msra.mxu0 %v83_v1  ;;  %v184_v5 = vld [vmem:[#allocation8 + $0x78] sm:$0xff]  ;;  %343 = vmatprep.subr.mxu1 %v200_v4  ;;  %v183_v7 = vld [vmem:[#allocation8 + $0x70] sm:$0xff]  ;;  %v198_v8 = vld [vmem:[#allocation8 + $0xe8] sm:$0xff]  ;;  %s324_s30 = sshll.u32 %s512_s29, 4  ;;  %s325_s30 = int_to_ptr.vmem [resolvable:$true] %s324_s30 }
  0x36   :  { %380 = vmatprep.subr.mxu0 %v510_v0  ;;  %344 = vmatpush3.msra.mxu1 %v184_v5  ;;  %v182_v9 = vld [vmem:[#allocation8 + $0x68] sm:$0xff]  ;;  %v197_v10 = vld [vmem:[#allocation8 + $0xe0] sm:$0xff]  ;;  %v196_v12 = vld [vmem:[#allocation8 + $0xd8] sm:$0xff]  ;;  %s476_s9 = scalar_lea.vmem %s325_s30, 128  ;;  %p481_p7 = scmp.lt.s32.totalorder %s325_s30, %s325_s30 }
  0x37   :  { %381 = vmatpush3.msra.mxu0 %v82_v2  ;;  %345 = vmatprep.subr.mxu1 %v199_v6  ;;  %v181_v11 = vld [vmem:[#allocation8 + $0x60] sm:$0xff]  ;;  %v180_v13 = vld [vmem:[#allocation8 + $0x58] sm:$0xff]  ;;  %v195_v14 = vld [vmem:[#allocation8 + $0xd0] sm:$0xff]  ;;  %p477_p6 = scmp.ne.s32.totalorder %s325_s30, %s476_s9  ;;  %p482_p8 = scmp.lt.s32.totalorder %s476_s9, %s476_s9 }
  0x38   :  { %383 = vmatmul.mubr.msk.f32.vlgmr.msra.gmra.mxu0 %vm91_vm1, %v81_v3  ;;  %346 = vmatpush3.msra.mxu1 %v183_v7  ;;  %v179_v15 = vld [vmem:[#allocation8 + $0x50] sm:$0xff]  ;;  %v194_v16 = vld [vmem:[#allocation8 + $0xc8] sm:$0xff]  ;;  %v193_v18 = vld [vmem:[#allocation8 + $0xc0] sm:$0xff] }
  0x39   :  { %347 = vmatprep.subr.mxu1 %v198_v8  ;;  %v178_v17 = vld [vmem:[#allocation8 + $0x48] sm:$0xff]  ;;  %v177_v19 = vld [vmem:[#allocation8 + $0x40] sm:$0xff]  ;;  %v192_v20 = vld [vmem:[#allocation8 + $0xb8] sm:$0xff]  ;;  %p483_p9 = por %p482_p8, %p481_p7 }
  0x3a   :  { %348 = vmatpush3.msra.mxu1 %v182_v9  ;;  %v176_v21 = vld [vmem:[#allocation8 + $0x38] sm:$0xff]  ;;  %v191_v22 = vld [vmem:[#allocation8 + $0xb0] sm:$0xff]  ;;  %v190_v24 = vld [vmem:[#allocation8 + $0xa8] sm:$0xff] }
  0x3b   :  { %349 = vmatprep.subr.mxu1 %v197_v10  ;;  %v175_v23 = vld [vmem:[#allocation8 + $0x30] sm:$0xff]  ;;  %v174_v25 = vld [vmem:[#allocation8 + $0x28] sm:$0xff]  ;;  %v189_v26 = vld [vmem:[#allocation8 + $0xa0] sm:$0xff]  ;;  %p484_p10 = pnand %p483_p9, %p477_p6 }
  0x3c   :  { %350 = vmatpush3.msra.mxu1 %v181_v11  ;;  %v173_v27 = vld [vmem:[#allocation8 + $0x20] sm:$0xff]  ;;  %v188_v28 = vld [vmem:[#allocation8 + $0x98] sm:$0xff]  ;;  %v187_v30 = vld [vmem:[#allocation8 + $0x90] sm:$0xff] }
  0x3d   :  { %351 = vmatprep.subr.mxu1 %v196_v12  ;;  %v172_v29 = vld [vmem:[#allocation8 + $0x18] sm:$0xff]  ;;  %v171_v31 = vld [vmem:[#allocation8 + $0x10] sm:$0xff]  ;;  %v186_v32 = vld [vmem:[#allocation8 + $0x88] sm:$0xff] }
  0x3e   :  { %352 = vmatpush3.msra.mxu1 %v180_v13  ;;  %v170_v33 = vld [vmem:[#allocation8 + $0x8] sm:$0xff]  ;;  %v185_v34 = vld [vmem:[#allocation8 + $0x80] sm:$0xff] }
  0x3f   :  { %353 = vmatprep.subr.mxu1 %v195_v14  ;;  %v169_v35 = vld [vmem:[#allocation8] sm:$0xff] }
  0x40   :  { %354 = vmatpush3.msra.mxu1 %v179_v15  ;;  %v168_v36 = vld [vmem:[#allocation2] sm:$0xff] }
  0x41   :  { %355 = vmatprep.subr.mxu1 %v194_v16  ;;  %272 = vmatprep.mubr.f32.mxu1 %v168_v36  ;;  %v335_v37 = vld [vmem:[%s588_s3] ss:$0 sm:$0xff] }
  0x42   :  { %356 = vmatpush3.msra.mxu1 %v178_v17  ;;  %v337_v44 = vld [vmem:[%s590_s5] ss:$0 sm:$0xff] }
  0x43   :  { %357 = vmatprep.subr.mxu1 %v193_v18  ;;  %v338_v2 = vld [vmem:[%s591_s6] ss:$0 sm:$0xff] }
  0x44   :  { %358 = vmatpush3.msra.mxu1 %v177_v19  ;;  %v339_v4 = vld [vmem:[%s592_s7] ss:$0 sm:$0xff] }
  0x45   :  { %359 = vmatprep.subr.mxu1 %v192_v20 }
  0x46   :  { %360 = vmatpush3.msra.mxu1 %v176_v21 }
  0x47   :  { %361 = vmatprep.subr.mxu1 %v191_v22 }
  0x48   :  { %362 = vmatpush3.msra.mxu1 %v175_v23 }
  0x49   :  { %363 = vmatprep.subr.mxu1 %v190_v24 }
  0x4a   :  { %364 = vmatpush3.msra.mxu1 %v174_v25 }
  0x4b   :  { %365 = vmatprep.subr.mxu1 %v189_v26 }
  0x4c   :  { %366 = vmatpush3.msra.mxu1 %v173_v27 }
  0x4d   :  { %367 = vmatprep.subr.mxu1 %v188_v28 }
  0x4e   :  { %368 = vmatpush3.msra.mxu1 %v172_v29 }
  0x4f   :  { %369 = vmatprep.subr.mxu1 %v187_v30 }
  0x50   :  { %370 = vmatpush3.msra.mxu1 %v171_v31 }
  0x51   :  { %371 = vmatprep.subr.mxu1 %v186_v32 }
  0x52   :  { %372 = vmatpush3.msra.mxu1 %v170_v33 }
  0x53   :  { %373 = vmatprep.subr.mxu1 %v185_v34 }
  0x54   :  { %374 = vmatpush3.msra.mxu1 %v169_v35 }
  0xf8   :  { %v161_v38 = vpop.f32.mrf.mxu0 }
  0xf9   :  { %v162_v39 = vadd.f32 %v335_v37, %v161_v38 }
  0xfa   :  { %v384_v40 = vpop.f32.mrf.mxu0 }
  0xfb   :  { %v166_v41 = vmul.f32 0.01, %v162_v39  ;;  %vm165_vm2 = vcmp.gt.f32.partialorder %v162_v39, 0.0 }
  0xfd   :  { %v167_v42 = vsel %vm165_vm2, %v162_v39, %v166_v41 }
  0xfe   :  { %273 = vmatmul.mubr.f32.vlgmr.msra.gmra.mxu1 %v167_v42 }
 0x1be   :  { %v375_v43 = vpop.f32.mrf.mxu1 }
 0x1c0   :  { %v376_v45 = vpop.f32.mrf.mxu1 }
 0x1c1   :  { %v377_v46 = vadd.f32 %v376_v45, %v375_v43 }
 0x1c3   :  { %v275_v47 = vadd.f32 %v377_v46, %v337_v44 }
 0x1c5   :  { %v280_v48 = vrot.slane %v275_v47, 4 }
 0x1c7   :  { %v281_v49 = vadd.f32 %v280_v48, %v275_v47 }
 0x1c9   :  { %v282_v50 = vrot.slane %v281_v49, 2 }
 0x1cb   :  { %v283_v51 = vadd.f32 %v282_v50, %v281_v49 }
 0x1cd   :  { %v284_v52 = vrot.slane %v283_v51, 1 }
 0x1cf   :  { %v285_v53 = vadd.f32 %v284_v52, %v283_v51 }
 0x1d1   :  { %v287_v54 = vmul.f32 0.125, %v285_v53 }
 0x1d3   :  { %v288_v55 = vsub.f32 %v275_v47, %v287_v54 }
 0x1d5   :  { %v289_v56 = vmul.f32 %v288_v55, %v288_v55 }
 0x1d7   :  { %v290_v57 = vrot.slane %v289_v56, 4 }
 0x1d9   :  { %v291_v58 = vadd.f32 %v290_v57, %v289_v56 }
 0x1db   :  { %v292_v59 = vrot.slane %v291_v58, 2 }
 0x1dd   :  { %v293_v60 = vadd.f32 %v292_v59, %v291_v58 }
 0x1df   :  { %v294_v61 = vrot.slane %v293_v60, 1 }
 0x1e1   :  { %v295_v62 = vadd.f32 %v294_v61, %v293_v60 }
 0x1e3   :  { %v296_v63 = vmul.f32 0.125, %v295_v62 }
 0x1e5   :  { %v297_v0 = vadd.f32 1e-05, %v296_v63 }
 0x1e7   :  { %394 = vrsqrt.f32 %v297_v0 }
 0x1f4   :  { %v395_v1 = vpop.eup %394 }
 0x1f5   :  { %v299_v3 = vmul.f32 %v395_v1, %v288_v55 }
 0x1f7   :  { %v306_v5 = vmul.f32 %v338_v2, %v299_v3 }
 0x1f9   :  { %v313_v6 = vadd.f32 %v339_v4, %v306_v5 }
 0x1fb   :  { %vm314_vm3 = vcmp.gt.f32.partialorder %v313_v6, 0.0  ;;  %v315_v7 = vmul.f32 0.01, %v313_v6 }
 0x1fd   :  { %v316_v8 = vsel %vm314_vm3, %v313_v6, %v315_v7 }
 0x1fe   :  { %317 = vst [vmem:[#allocation10] sm:$0xff] %v316_v8 }
 0x1ff   :  { %487 = shalt.err (!%p484_p10)
}
 0x200   :  { %327 = dma.vmem_to_hbm [thread:$0]  %s325_s30, 128, %s593_s8, [#allocation4]  }
 0x201   :  { %502 = dma.done.wait [#allocation4], 128  }
 0x202   :  { %503 = vsyncadd [#allocation4], 4294967168 }
 0x203   :  { %331 = vsyncpa [#allocation3], 1 }
 0x204   :  { %332 = vsyncpa [#allocation6], 1 }
 0x205   :  { %333 = vsyncpa [#allocation9], 1 }
 0x206   :  { %334 = vsyncpa [#allocation4], 1 }

</bundles_post_ra>
